<compile_context>
chip_gen: v5e
topology: v5e:2x2
jax: 0.10.0
libtpu: 0.0.40
codegen_flags: <defaults>
</compile_context>

<pallas_src>
import functools

import jax
import jax.numpy as jnp
from jax.experimental import pallas as pl
from jax.experimental.pallas import tpu as pltpu


def encoder_kernel(x_ref,
                   w1_ref, b1_ref,
                   w2_ref, b2_ref,
                   wh_ref, bh_ref,
                   out_ref):
    # fc1 + ReLU  (MXU matmul, f32 accumulation; bias/ReLU in f32)
    h1 = jnp.dot(x_ref[...], w1_ref[...], preferred_element_type=jnp.float32)
    h1 = jnp.maximum(h1 + b1_ref[...], 0.0).astype(w2_ref.dtype)   # (tb, 256)

    # fc2 + ReLU
    h2 = jnp.dot(h1, w2_ref[...], preferred_element_type=jnp.float32)
    h2 = jnp.maximum(h2 + b2_ref[...], 0.0).astype(wh_ref.dtype)   # (tb, 128)

    # fused heads: [mu | logsigma] in a single matmul + single writeback
    y = jnp.dot(h2, wh_ref[...], preferred_element_type=jnp.float32)
    out_ref[...] = (y + bh_ref[...]).astype(out_ref.dtype)         # (tb, 2*L)


@functools.partial(jax.jit, static_argnames=("tb", "compute_dtype"))
def encoder_forward(x, params, *, tb=512, compute_dtype=jnp.bfloat16):
    """x: (B, state_size) f32. params: dict of (in,out) weights + (1,out) biases.

    Returns (mu, logsigma), each (B, latent_size) in x.dtype.
    """
    B, state_size = x.shape
    latent_size = params["wmu"].shape[1]

    # Batch tile: as large as possible (multiple of 8; >=256 fills the MXU
    # M-dim). Clamp to B for small batches.
    tb = min(tb, B)
    assert tb == B or tb % 8 == 0, "tb must be a multiple of 8 or equal B"

    # Cast matmul operands to the compute dtype (bf16 -> native MXU rate on
    # v6e/v7x); accumulation stays f32 inside the kernel. Biases stay f32.
    xc = x.astype(compute_dtype)
    w1 = params["w1"].astype(compute_dtype)
    w2 = params["w2"].astype(compute_dtype)
    # Fuse the two heads: one (128, 2*latent) weight, one (1, 2*latent) bias.
    wh = jnp.concatenate([params["wmu"], params["wls"]], axis=1).astype(compute_dtype)
    bh = jnp.concatenate([params["bmu"], params["bls"]], axis=1)
    b1, b2 = params["b1"], params["b2"]

    def rep(a):
        # Replicated (weight / bias) block: whole array, same block each step.
        return pl.BlockSpec(a.shape, lambda i: (0, 0))

    y = pl.pallas_call(
        encoder_kernel,
        out_shape=jax.ShapeDtypeStruct((B, 2 * latent_size), x.dtype),
        grid=(pl.cdiv(B, tb),),
        in_specs=[
            pl.BlockSpec((tb, state_size), lambda i: (i, 0)),   # x tile
            rep(w1), rep(b1),
            rep(w2), rep(b2),
            rep(wh), rep(bh),
        ],
        out_specs=pl.BlockSpec((tb, 2 * latent_size), lambda i: (i, 0)),
        compiler_params=pltpu.CompilerParams(
            dimension_semantics=("parallel",)),
    )(xc, w1, b1, w2, b2, wh, bh)

    return y[:, :latent_size], y[:, latent_size:]


def init_params(key, state_size, latent_size):
    """Deterministic synthetic parameters. Weights stored as (in, out)."""
    ks = jax.random.split(key, 8)

    def linear(kw, kb, fan_in, fan_out):
        # mimic PyTorch default init scale (uniform +- 1/sqrt(fan_in))
        bound = 1.0 / jnp.sqrt(fan_in)
        w = jax.random.uniform(kw, (fan_in, fan_out), jnp.float32, -bound, bound)
        b = jax.random.uniform(kb, (1, fan_out), jnp.float32, -bound, bound)
        return w, b

    w1, b1 = linear(ks[0], ks[1], state_size, 256)
    w2, b2 = linear(ks[2], ks[3], 256, 128)
    wmu, bmu = linear(ks[4], ks[5], 128, latent_size)
    wls, bls = linear(ks[6], ks[7], 128, latent_size)
    return dict(w1=w1, b1=b1, w2=w2, b2=b2,
                wmu=wmu, bmu=bmu, wls=wls, bls=bls)


def encoder_reference(x, p, compute_dtype=jnp.float32):
    """Pure-JAX reference matching the PyTorch forward (with the same
    operand-dtype handling as the kernel: matmuls in compute_dtype with f32
    accumulation, bias/ReLU in f32)."""
    w1 = p["w1"].astype(compute_dtype)
    w2 = p["w2"].astype(compute_dtype)
    wmu = p["wmu"].astype(compute_dtype)
    wls = p["wls"].astype(compute_dtype)
    h1 = jax.nn.relu(
        jnp.dot(x.astype(compute_dtype), w1, preferred_element_type=jnp.float32)
        + p["b1"])
    h2 = jax.nn.relu(
        jnp.dot(h1.astype(compute_dtype), w2, preferred_element_type=jnp.float32)
        + p["b2"])
    mu = jnp.dot(h2.astype(compute_dtype), wmu,
                 preferred_element_type=jnp.float32) + p["bmu"]
    ls = jnp.dot(h2.astype(compute_dtype), wls,
                 preferred_element_type=jnp.float32) + p["bls"]
    return mu, ls


if __name__ == "__main__":
    state_size = 32
    latent_size = 8
    batch = 16

    key = jax.random.PRNGKey(0)
    kx, kp = jax.random.split(key)
    x = jax.random.normal(kx, (batch, state_size), jnp.float32)
    params = init_params(kp, state_size, latent_size)

    # 1) f32 compute path: exact check against the reference.
    mu, logsigma = encoder_forward(x, params, tb=512, compute_dtype=jnp.float32)
    jax.block_until_ready((mu, logsigma))
    mu_ref, ls_ref = encoder_reference(x, params, jnp.float32)
    assert mu.shape == (batch, latent_size) and logsigma.shape == (batch, latent_size)
    assert jnp.allclose(mu, mu_ref, atol=1e-5, rtol=1e-5)
    assert jnp.allclose(logsigma, ls_ref, atol=1e-5, rtol=1e-5)

    # 2) bf16 compute path (default perf path): check against the bf16-cast
    #    reference with a tolerance appropriate for bf16 operands.
    mu_b, ls_b = encoder_forward(x, params, tb=512)
    jax.block_until_ready((mu_b, ls_b))
    mu_rb, ls_rb = encoder_reference(x, params, jnp.bfloat16)
    assert jnp.allclose(mu_b, mu_rb, atol=2e-2, rtol=2e-2)
    assert jnp.allclose(ls_b, ls_rb, atol=2e-2, rtol=2e-2)

    print("KERNEL_OK")
</pallas_src>

<mosaic_0001>
module attributes {stable_mosaic.version = 11 : i64} {
  func.func @encoder_kernel(%arg0: i32, %arg1: memref<16x32xf32, #tpu.memory_space<vmem>>, %arg2: memref<32x256xf32, #tpu.memory_space<vmem>>, %arg3: memref<1x256xf32, #tpu.memory_space<vmem>>, %arg4: memref<256x128xf32, #tpu.memory_space<vmem>>, %arg5: memref<1x128xf32, #tpu.memory_space<vmem>>, %arg6: memref<128x16xf32, #tpu.memory_space<vmem>>, %arg7: memref<1x16xf32, #tpu.memory_space<vmem>>, %arg8: memref<16x16xf32, #tpu.memory_space<vmem>>) attributes {dimension_semantics = [#tpu.dimension_semantics<parallel>], iteration_bounds = array<i64: 1>, scalar_prefetch = 0 : i64, scratch_operands = 0 : i64, tpu.core_type = #tpu.core_type<tc>, window_params = [{transform_indices = @transform_0, window_bounds = array<i64: 16, 32>}, {pipeline_mode = #tpu.pipeline_mode<synchronous>, transform_indices = @transform_1, window_bounds = array<i64: 32, 256>}, {pipeline_mode = #tpu.pipeline_mode<synchronous>, transform_indices = @transform_2, window_bounds = array<i64: 1, 256>}, {pipeline_mode = #tpu.pipeline_mode<synchronous>, transform_indices = @transform_3, window_bounds = array<i64: 256, 128>}, {pipeline_mode = #tpu.pipeline_mode<synchronous>, transform_indices = @transform_4, window_bounds = array<i64: 1, 128>}, {pipeline_mode = #tpu.pipeline_mode<synchronous>, transform_indices = @transform_5, window_bounds = array<i64: 128, 16>}, {pipeline_mode = #tpu.pipeline_mode<synchronous>, transform_indices = @transform_6, window_bounds = array<i64: 1, 16>}, {transform_indices = @transform_7, window_bounds = array<i64: 16, 16>}]} {
    %c0 = arith.constant 0 : index
    %c0_0 = arith.constant 0 : index
    %0 = vector.load %arg1[%c0, %c0_0] : memref<16x32xf32, #tpu.memory_space<vmem>>, vector<16x32xf32>
    %c0_1 = arith.constant 0 : index
    %c0_2 = arith.constant 0 : index
    %1 = vector.load %arg2[%c0_1, %c0_2] : memref<32x256xf32, #tpu.memory_space<vmem>>, vector<32x256xf32>
    %cst = arith.constant dense<0.000000e+00> : vector<16x256xf32>
    %2 = tpu.matmul %0, %1, %cst {dimension_numbers = #tpu.dot_dimension_numbers<[1], [0], [0], [1], [0, 0, 1, 1], [], []>} : vector<16x32xf32>, vector<32x256xf32>, vector<16x256xf32> -> vector<16x256xf32>
    %c0_3 = arith.constant 0 : index
    %c0_4 = arith.constant 0 : index
    %3 = vector.load %arg3[%c0_3, %c0_4] : memref<1x256xf32, #tpu.memory_space<vmem>>, vector<1x256xf32>
    %4 = vector.broadcast %3 : vector<1x256xf32> to vector<16x256xf32>
    %5 = arith.addf %2, %4 : vector<16x256xf32>
    %cst_5 = arith.constant 0.000000e+00 : f32
    %6 = vector.broadcast %cst_5 : f32 to vector<16x256xf32>
    %7 = arith.maximumf %5, %6 : vector<16x256xf32>
    %c0_6 = arith.constant 0 : index
    %c0_7 = arith.constant 0 : index
    %8 = vector.load %arg4[%c0_6, %c0_7] : memref<256x128xf32, #tpu.memory_space<vmem>>, vector<256x128xf32>
    %cst_8 = arith.constant dense<0.000000e+00> : vector<16x128xf32>
    %9 = tpu.matmul %7, %8, %cst_8 {dimension_numbers = #tpu.dot_dimension_numbers<[1], [0], [0], [1], [0, 0, 1, 1], [], []>} : vector<16x256xf32>, vector<256x128xf32>, vector<16x128xf32> -> vector<16x128xf32>
    %c0_9 = arith.constant 0 : index
    %c0_10 = arith.constant 0 : index
    %10 = vector.load %arg5[%c0_9, %c0_10] : memref<1x128xf32, #tpu.memory_space<vmem>>, vector<1x128xf32>
    %11 = vector.broadcast %10 : vector<1x128xf32> to vector<16x128xf32>
    %12 = arith.addf %9, %11 : vector<16x128xf32>
    %cst_11 = arith.constant 0.000000e+00 : f32
    %13 = vector.broadcast %cst_11 : f32 to vector<16x128xf32>
    %14 = arith.maximumf %12, %13 : vector<16x128xf32>
    %c0_12 = arith.constant 0 : index
    %c0_13 = arith.constant 0 : index
    %15 = vector.load %arg6[%c0_12, %c0_13] : memref<128x16xf32, #tpu.memory_space<vmem>>, vector<128x16xf32>
    %cst_14 = arith.constant dense<0.000000e+00> : vector<16x16xf32>
    %16 = tpu.matmul %14, %15, %cst_14 {dimension_numbers = #tpu.dot_dimension_numbers<[1], [0], [0], [1], [0, 0, 1, 1], [], []>} : vector<16x128xf32>, vector<128x16xf32>, vector<16x16xf32> -> vector<16x16xf32>
    %c0_15 = arith.constant 0 : index
    %c0_16 = arith.constant 0 : index
    %17 = vector.load %arg7[%c0_15, %c0_16] : memref<1x16xf32, #tpu.memory_space<vmem>>, vector<1x16xf32>
    %18 = vector.broadcast %17 : vector<1x16xf32> to vector<16x16xf32>
    %19 = arith.addf %16, %18 : vector<16x16xf32>
    %c0_17 = arith.constant 0 : index
    %c0_18 = arith.constant 0 : index
    %20 = vector.load %arg8[%c0_17, %c0_18] : memref<16x16xf32, #tpu.memory_space<vmem>>, vector<16x16xf32>
    tpu.vector_store %arg8[%c0_17, %c0_18], %19 {strides = array<i32>} : memref<16x16xf32, #tpu.memory_space<vmem>>, vector<16x16xf32>,
    return
  }
  func.func @transform_0(%arg0: i32) -> (i32, i32) {
    %c0_i32 = arith.constant 0 : i32
    %c0_i32_0 = arith.constant 0 : i32
    return %arg0, %c0_i32 : i32, i32
  }
  func.func @transform_1(%arg0: i32) -> (i32, i32) {
    %c0_i32 = arith.constant 0 : i32
    %c0_i32_0 = arith.constant 0 : i32
    %c0_i32_1 = arith.constant 0 : i32
    return %c0_i32, %c0_i32_0 : i32, i32
  }
  func.func @transform_2(%arg0: i32) -> (i32, i32) {
    %c0_i32 = arith.constant 0 : i32
    %c0_i32_0 = arith.constant 0 : i32
    %c0_i32_1 = arith.constant 0 : i32
    return %c0_i32, %c0_i32_0 : i32, i32
  }
  func.func @transform_3(%arg0: i32) -> (i32, i32) {
    %c0_i32 = arith.constant 0 : i32
    %c0_i32_0 = arith.constant 0 : i32
    %c0_i32_1 = arith.constant 0 : i32
    return %c0_i32, %c0_i32_0 : i32, i32
  }
  func.func @transform_4(%arg0: i32) -> (i32, i32) {
    %c0_i32 = arith.constant 0 : i32
    %c0_i32_0 = arith.constant 0 : i32
    %c0_i32_1 = arith.constant 0 : i32
    return %c0_i32, %c0_i32_0 : i32, i32
  }
  func.func @transform_5(%arg0: i32) -> (i32, i32) {
    %c0_i32 = arith.constant 0 : i32
    %c0_i32_0 = arith.constant 0 : i32
    %c0_i32_1 = arith.constant 0 : i32
    return %c0_i32, %c0_i32_0 : i32, i32
  }
  func.func @transform_6(%arg0: i32) -> (i32, i32) {
    %c0_i32 = arith.constant 0 : i32
    %c0_i32_0 = arith.constant 0 : i32
    %c0_i32_1 = arith.constant 0 : i32
    return %c0_i32, %c0_i32_0 : i32, i32
  }
  func.func @transform_7(%arg0: i32) -> (i32, i32) {
    %c0_i32 = arith.constant 0 : i32
    %c0_i32_0 = arith.constant 0 : i32
    return %arg0, %c0_i32 : i32, i32
  }
}

</mosaic_0001>

<bundles_post_ra>
// kernel: encoder_forward.1
= control target key start
LH: loop header
LB: loop body
LE: loop exit
PB: predicated region body
PF: predicated region fallthrough
CT: control target
= control target key end

     0   :  { %12 = vsyncpa [#allocation3], 0  ;;  %s285_s27 = smov [#allocation2]   ;;  %s286_s29 = smov 128   ;;  %s428_s0 = inlined_call_operand.vmem [shape: f32[16,32], index: 0, kind: input, shape index: {}]   ;;  %s429_s1 = inlined_call_operand.vmem [shape: f32[32,256], index: 1, kind: input, shape index: {}]   ;;  %s430_s2 = inlined_call_operand.vmem [shape: f32[1,256], index: 2, kind: input, shape index: {}]   ;;  %s431_s3 = inlined_call_operand.hbm [shape: f32[256,128], index: 3, kind: input, shape index: {}]   ;;  %s432_s4 = inlined_call_operand.vmem [shape: f32[1,128], index: 4, kind: input, shape index: {}]   ;;  %s433_s5 = inlined_call_operand.vmem [shape: f32[128,16], index: 5, kind: input, shape index: {}]   ;;  %s434_s6 = inlined_call_operand.vmem [shape: f32[1,16], index: 6, kind: input, shape index: {}]   ;;  %s435_s7 = inlined_call_operand.vmem [shape: f32[16,16], index: 7, kind: output, shape index: {}]  }
   0x1   :  { %s23_s26 = sshll.u32 %s431_s3, 4  ;;  %s25_s28 = sshll.u32 %s285_s27, 4  ;;  %s24_s26 = int_to_ptr.hbm [resolvable:$true] %s23_s26  ;;  %s26_s28 = int_to_ptr.vmem [resolvable:$true] %s25_s28 }
   0x2   :  { %s287_s30 = smov 8  }
   0x3   :  { %31 = dma.hbm_to_vmem [thread:$0]  %s24_s26, 4096, %s26_s28, [#allocation3], %s286_s29, %s286_s29, %s287_s30  }
   0x4   :  { %283 = dma.done.wait [#allocation3], 4096  }
   0x5   :  { %284 = vsyncadd [#allocation3], 4294963200  ;;  %v50_v0 = vld [vmem:[%s429_s1 + $0x30] sm:$0xff]  ;;  %v48_v1 = vld [vmem:[%s429_s1 + $0x20] sm:$0xff]  ;;  %vm58_vm0 = vcmask 261120   ;;  %vm242_vm1 = vcmask 130048  }
   0x6   :  { %77 = vmatpush.msra.mxu1 %v50_v0  ;;  %v46_v2 = vld [vmem:[%s429_s1 + $0x10] sm:$0xff]  ;;  %v130_v3 = vld [vmem:[#allocation2 + $0x78] sm:$0xff]  ;;  %v44_v5 = vld [vmem:[%s429_s1] sm:$0xff] }
   0x7   :  { %v129_v4 = vld [vmem:[#allocation2 + $0x70] sm:$0xff]  ;;  %151 = vmatpush.msra.mxu2 %v130_v3  ;;  %v42_v6 = vld [vmem:[%s428_s0] sm:$0xff]  ;;  %v128_v7 = vld [vmem:[#allocation2 + $0x68] sm:$0xff] }
   0x8   :  { %78 = vmatpush.msra.mxu1 %v48_v1  ;;  %v51_v8 = vld [vmem:[%s429_s1 + $0x38] sm:$0xff]  ;;  %v127_v10 = vld [vmem:[#allocation2 + $0x60] sm:$0xff]  ;;  %v145_v11 = vld [vmem:[#allocation2 + $0xf0] sm:$0xff] }
   0x9   :  { %152 = vmatpush.msra.mxu2 %v129_v4  ;;  %v146_v9 = vld [vmem:[#allocation2 + $0xf8] sm:$0xff]  ;;  %v49_v12 = vld [vmem:[%s429_s1 + $0x28] sm:$0xff]  ;;  %v143_v16 = vld [vmem:[#allocation2 + $0xe0] sm:$0xff] }
   0xa   :  { %79 = vmatpush.msra.mxu1 %v46_v2  ;;  %174 = vmatpush.msra.mxu3 %v146_v9  ;;  %v144_v13 = vld [vmem:[#allocation2 + $0xe8] sm:$0xff]  ;;  %v126_v14 = vld [vmem:[#allocation2 + $0x58] sm:$0xff]  ;;  %v125_v17 = vld [vmem:[#allocation2 + $0x50] sm:$0xff] }
   0xb   :  { %153 = vmatpush.msra.mxu2 %v128_v7  ;;  %v47_v15 = vld [vmem:[%s429_s1 + $0x18] sm:$0xff]  ;;  %v45_v18 = vld [vmem:[%s429_s1 + $0x8] sm:$0xff]  ;;  %v123_v22 = vld [vmem:[#allocation2 + $0x40] sm:$0xff] }
   0xc   :  { %80 = vmatpush.msra.mxu1 %v44_v5  ;;  %175 = vmatpush.msra.mxu3 %v145_v11  ;;  %v142_v19 = vld [vmem:[#allocation2 + $0xd8] sm:$0xff]  ;;  %v43_v20 = vld [vmem:[%s428_s0 + $0x8] sm:$0xff]  ;;  %v121_v24 = vld [vmem:[#allocation2 + $0x30] sm:$0xff] }
   0xd   :  { %250 = vmatmul.msk.f32.vlgmr.msra.gmra.mxu1 %vm58_vm0, %v42_v6  ;;  %154 = vmatpush.msra.mxu2 %v127_v10  ;;  %v124_v21 = vld [vmem:[#allocation2 + $0x48] sm:$0xff]  ;;  %v122_v23 = vld [vmem:[#allocation2 + $0x38] sm:$0xff]  ;;  %v119_v26 = vld [vmem:[#allocation2 + $0x20] sm:$0xff] }
   0xe   :  { %100 = vmatpush.msrb.mxu1 %v51_v8  ;;  %176 = vmatpush.msra.mxu3 %v144_v13  ;;  %v120_v25 = vld [vmem:[#allocation2 + $0x28] sm:$0xff]  ;;  %v118_v27 = vld [vmem:[#allocation2 + $0x18] sm:$0xff]  ;;  %v117_v28 = vld [vmem:[#allocation2 + $0x10] sm:$0xff] }
   0xf   :  { %155 = vmatpush.msra.mxu2 %v126_v14  ;;  %v141_v29 = vld [vmem:[#allocation2 + $0xd0] sm:$0xff]  ;;  %v116_v30 = vld [vmem:[#allocation2 + $0x8] sm:$0xff]  ;;  %v115_v32 = vld [vmem:[#allocation2] sm:$0xff] }
  0x10   :  { %101 = vmatpush.msrb.mxu1 %v49_v12  ;;  %177 = vmatpush.msra.mxu3 %v143_v16  ;;  %v140_v31 = vld [vmem:[#allocation2 + $0xc8] sm:$0xff]  ;;  %v139_v33 = vld [vmem:[#allocation2 + $0xc0] sm:$0xff]  ;;  %v138_v34 = vld [vmem:[#allocation2 + $0xb8] sm:$0xff] }
  0x11   :  { %156 = vmatpush.msra.mxu2 %v125_v17  ;;  %v137_v35 = vld [vmem:[#allocation2 + $0xb0] sm:$0xff]  ;;  %v136_v36 = vld [vmem:[#allocation2 + $0xa8] sm:$0xff]  ;;  %v135_v37 = vld [vmem:[#allocation2 + $0xa0] sm:$0xff] }
  0x12   :  { %102 = vmatpush.msrb.mxu1 %v47_v15  ;;  %178 = vmatpush.msra.mxu3 %v142_v19  ;;  %v134_v38 = vld [vmem:[#allocation2 + $0x98] sm:$0xff]  ;;  %v133_v39 = vld [vmem:[#allocation2 + $0x90] sm:$0xff]  ;;  %v132_v40 = vld [vmem:[#allocation2 + $0x88] sm:$0xff] }
  0x13   :  { %157 = vmatpush.msra.mxu2 %v124_v21  ;;  %v131_v41 = vld [vmem:[#allocation2 + $0x80] sm:$0xff]  ;;  %v214_v44 = vld [vmem:[%s433_s5 + $0x78] sm:$0xff]  ;;  %v213_v45 = vld [vmem:[%s433_s5 + $0x70] sm:$0xff] }
  0x14   :  { %103 = vmatpush.msrb.mxu1 %v45_v18  ;;  %179 = vmatpush.msra.mxu3 %v141_v29  ;;  %v52_v42 = vld [vmem:[%s430_s2] sm:$0x3]  ;;  %v212_v46 = vld [vmem:[%s433_s5 + $0x68] sm:$0xff]  ;;  %v210_v51 = vld [vmem:[%s433_s5 + $0x58] sm:$0xff] }
  0x15   :  { %251 = vmatmul.msk.f32.gmra.mxu1 %vm58_vm0, %v43_v20  ;;  %158 = vmatpush.msra.mxu2 %v123_v22  ;;  %v54_v43 = vperm.slane %v52_v42, 0  ;;  %v211_v49 = vld [vmem:[%s433_s5 + $0x60] sm:$0xff]  ;;  %v55_v55 = vperm.slane %v52_v42, 1  ;;  %v209_v62 = vld [vmem:[%s433_s5 + $0x50] sm:$0xff]  ;;  %v208_v63 = vld [vmem:[%s433_s5 + $0x48] sm:$0xff] }
  0x16   :  { %180 = vmatpush.msra.mxu3 %v140_v31  ;;  %219 = vmatpush.msra.mxu0 %v214_v44  ;;  %v207_v0 = vld [vmem:[%s433_s5 + $0x40] sm:$0xff]  ;;  %v206_v1 = vld [vmem:[%s433_s5 + $0x38] sm:$0xff]  ;;  %v205_v2 = vld [vmem:[%s433_s5 + $0x30] sm:$0xff] }
  0x17   :  { %159 = vmatpush.msra.mxu2 %v122_v23  ;;  %v204_v3 = vld [vmem:[%s433_s5 + $0x28] sm:$0xff]  ;;  %v203_v4 = vld [vmem:[%s433_s5 + $0x20] sm:$0xff]  ;;  %v202_v5 = vld [vmem:[%s433_s5 + $0x18] sm:$0xff] }
  0x18   :  { %181 = vmatpush.msra.mxu3 %v139_v33  ;;  %220 = vmatpush.msra.mxu0 %v213_v45  ;;  %v200_v7 = vld [vmem:[%s433_s5 + $0x8] sm:$0xff]  ;;  %v199_v8 = vld [vmem:[%s433_s5] sm:$0xff] }
  0x19   :  { %160 = vmatpush.msra.mxu2 %v121_v24  ;;  %v257_v10 = vld [vmem:[%s432_s4] ss:$0 sm:$0xff] }
  0x1a   :  { %182 = vmatpush.msra.mxu3 %v138_v34  ;;  %221 = vmatpush.msra.mxu0 %v212_v46 }
  0x1b   :  { %161 = vmatpush.msra.mxu2 %v120_v25 }
  0x1c   :  { %183 = vmatpush.msra.mxu3 %v137_v35  ;;  %222 = vmatpush.msra.mxu0 %v211_v49 }
  0x1d   :  { %252 = vmatmul.msk.f32.vlgmr.msrb.gmra.mxu1 %vm58_vm0, %v42_v6  ;;  %162 = vmatpush.msra.mxu2 %v119_v26  ;;  %v201_v6 = vld [vmem:[%s433_s5 + $0x10] sm:$0xff] }
  0x1e   :  { %184 = vmatpush.msra.mxu3 %v136_v36  ;;  %223 = vmatpush.msra.mxu0 %v210_v51 }
  0x1f   :  { %163 = vmatpush.msra.mxu2 %v118_v27 }
  0x20   :  { %185 = vmatpush.msra.mxu3 %v135_v37  ;;  %224 = vmatpush.msra.mxu0 %v209_v62 }
  0x21   :  { %164 = vmatpush.msra.mxu2 %v117_v28 }
  0x22   :  { %186 = vmatpush.msra.mxu3 %v134_v38  ;;  %225 = vmatpush.msra.mxu0 %v208_v63 }
  0x23   :  { %165 = vmatpush.msra.mxu2 %v116_v30 }
  0x24   :  { %187 = vmatpush.msra.mxu3 %v133_v39  ;;  %226 = vmatpush.msra.mxu0 %v207_v0 }
  0x25   :  { %253 = vmatmul.msk.f32.gmra.mxu1 %vm58_vm0, %v43_v20  ;;  %166 = vmatpush.msra.mxu2 %v115_v32  ;;  %v258_v20 = vld [vmem:[%s434_s6] ss:$0 sm:$0xff] }
  0x26   :  { %188 = vmatpush.msra.mxu3 %v132_v40  ;;  %227 = vmatpush.msra.mxu0 %v206_v1 }
  0x28   :  { %189 = vmatpush.msra.mxu3 %v131_v41  ;;  %228 = vmatpush.msra.mxu0 %v205_v2 }
  0x2a   :  { %229 = vmatpush.msra.mxu0 %v204_v3 }
  0x2c   :  { %230 = vmatpush.msra.mxu0 %v203_v4 }
  0x2e   :  { %231 = vmatpush.msra.mxu0 %v202_v5 }
  0x30   :  { %232 = vmatpush.msra.mxu0 %v201_v6 }
  0x32   :  { %233 = vmatpush.msra.mxu0 %v200_v7 }
  0x34   :  { %234 = vmatpush.msra.mxu0 %v199_v8 }
  0x8a   :  { %v82_v47 = vpop.f32.mrf.mxu1 }
  0x8b   :  { %v83_v48 = vadd.f32 %v82_v47, %v54_v43 }
  0x8d   :  { %v111_v50 = vmax.f32 %v83_v48, 0.0 }
  0x8f   :  { %167 = vmatmul.f32.vlgmr.msra.gmra.mxu2 %v111_v50 }
  0x92   :  { %v85_v52 = vpop.f32.mrf.mxu1 }
  0x93   :  { %v86_v53 = vadd.f32 %v85_v52, %v54_v43 }
  0x95   :  { %v113_v54 = vmax.f32 %v86_v53, 0.0 }
  0x97   :  { %170 = vmatmul.f32.gmra.mxu2 %v113_v54 }
  0x9a   :  { %v105_v56 = vpop.f32.mrf.mxu1 }
  0x9b   :  { %v106_v57 = vadd.f32 %v105_v56, %v55_v55 }
  0x9d   :  { %v112_v58 = vmax.f32 %v106_v57, 0.0 }
  0x9f   :  { %190 = vmatmul.f32.vlgmr.msra.gmra.mxu3 %v112_v58 }
  0xa2   :  { %v108_v59 = vpop.f32.mrf.mxu1 }
  0xa3   :  { %v109_v60 = vadd.f32 %v108_v59, %v55_v55 }
  0xa5   :  { %v114_v61 = vmax.f32 %v109_v60, 0.0 }
  0xa7   :  { %193 = vmatmul.f32.gmra.mxu3 %v114_v61 }
 0x112   :  { %v168_v9 = vpop.f32.mrf.mxu2 }
 0x113   :  { %v169_v11 = vadd.f32 %v257_v10, %v168_v9 }
 0x11a   :  { %v171_v15 = vpop.f32.mrf.mxu2 }
 0x11b   :  { %v172_v16 = vadd.f32 %v257_v10, %v171_v15 }
 0x122   :  { %v191_v12 = vpop.f32.mrf.mxu3 }
 0x123   :  { %v192_v13 = vadd.f32 %v191_v12, %v169_v11 }
 0x125   :  { %v197_v14 = vmax.f32 %v192_v13, 0.0 }
 0x127   :  { %235 = vmatmul.f32.vlgmr.msra.gmra.mxu0 %v197_v14 }
 0x12a   :  { %v194_v17 = vpop.f32.mrf.mxu3 }
 0x12b   :  { %v195_v18 = vadd.f32 %v194_v17, %v172_v16 }
 0x12d   :  { %v198_v19 = vmax.f32 %v195_v18, 0.0 }
 0x12f   :  { %238 = vmatmul.f32.gmra.mxu0 %v198_v19 }
 0x1a4   :  { %v236_v21 = vpop.f32.mrf.mxu0 }
 0x1a5   :  { %v237_v22 = vadd.f32 %v258_v20, %v236_v21 }
 0x1a7   :  { %243 = vst.msk [vmem:[%s435_s7] sm:$0xff] %vm242_vm1, %v237_v22 }
 0x1ac   :  { %v239_v23 = vpop.f32.mrf.mxu0 }
 0x1ad   :  { %v240_v24 = vadd.f32 %v258_v20, %v239_v23 }
 0x1af   :  { %244 = vst.msk [vmem:[%s435_s7 + $0x8] sm:$0xff] %vm242_vm1, %v240_v24 }
 0x1b0   :  { %249 = vsyncpa [#allocation3], 1 }

</bundles_post_ra>
